<compile_context>
chip_gen: v7x
topology: tpu7x:2x2x1
jax: 0.10.0
libtpu: 0.0.40
codegen_flags: <defaults>
</compile_context>

<pallas_src>
import functools

import jax
import jax.numpy as jnp
import numpy as np
from jax.experimental import pallas as pl
from jax.experimental.pallas import tpu as pltpu


def _round_up(n, m):
    return ((n + m - 1) // m) * m


# ---------------------------------------------------------------------------
# Kernel: full recurrence over T steps inside one pallas_call.
# Grid axis 0 = time step (sequential / "arbitrary").
# ---------------------------------------------------------------------------
def _gru_seq_kernel(
    x_ref,      # (B, I)       x[t]        (streamed per step)
    mask_ref,   # (B, 1)       mask[t]     (streamed per step)
    s0_ref,     # (B, Hp)      initial hidden state              (resident)
    w_ref,      # (I, 3*Hp)    [Wz|Wr|Ws].T, lane-padded per gate (resident)
    uzr_ref,    # (Hp, 2*Hp)   [Uz|Ur].T, lane/row padded         (resident)
    us_ref,     # (Hp, Hp)     Us.T, lane/row padded              (resident)
    b_ref,      # (1, 3*Hp)    [bz|br|bs], lane-padded, f32       (resident)
    out_ref,    # (B, Hp)      hidden state after this step
    s_scr,      # (B, Hp) f32  VMEM scratch: carried hidden state
):
    t = pl.program_id(0)

    @pl.when(t == 0)
    def _():
        s_scr[...] = s0_ref[...]

    Hp = s_scr.shape[1]
    s = s_scr[...]                       # carried state, f32
    mask = mask_ref[...]                 # (B, 1)

    w = w_ref[...]
    uzr = uzr_ref[...]
    us = us_ref[...]
    mm_dtype = w.dtype                   # f32 or bf16 matmul operands

    # One fused MXU pass for the input contribution of all 3 gates (+ biases),
    # one for the hidden contribution of z and r.  Accumulation always f32.
    gx = jnp.dot(x_ref[...].astype(mm_dtype), w,
                 preferred_element_type=jnp.float32) + b_ref[...]        # (B, 3*Hp)
    gh = jnp.dot(s.astype(mm_dtype), uzr,
                 preferred_element_type=jnp.float32)                     # (B, 2*Hp)

    # Single sigmoid over the (z | r) tile; all slices land on 128-lane boundaries.
    zr = jax.nn.sigmoid(gx[:, : 2 * Hp] + gh)
    z = zr[:, :Hp]
    r = zr[:, Hp:]

    s_hat = jnp.maximum(
        gx[:, 2 * Hp:]
        + jnp.dot((s * r).astype(mm_dtype), us, preferred_element_type=jnp.float32),
        0.0,
    )

    # s' = (1-z)*s + z*s_hat ;  out = s*(1-mask) + s'*mask  =  s + (mask*z)*(s_hat - s)
    new_s = s + (mask * z) * (s_hat - s)
    s_scr[...] = new_s
    out_ref[...] = new_s


# ---------------------------------------------------------------------------
# One-time weight packing (hoisted out of the per-call / per-step path).
# ---------------------------------------------------------------------------
def pack_gru_params(params, matmul_dtype=jnp.float32):
    """Packs GRUCell params into the fused, lane-aligned MXU layout (call ONCE)."""
    H, _ = params["Wz"].shape
    Hp = _round_up(H, 128)

    def pad_cols(m):          # (rows, H) -> (rows, Hp)
        return jnp.pad(m, ((0, 0), (0, Hp - H)))

    def pad_rows(m):          # (H, cols) -> (Hp, cols)
        return jnp.pad(m, ((0, Hp - H), (0, 0)))

    w_pack = jnp.concatenate(
        [pad_cols(params["Wz"].T), pad_cols(params["Wr"].T), pad_cols(params["Ws"].T)],
        axis=1,
    ).astype(matmul_dtype)                                            # (I, 3*Hp)
    uzr_pack = pad_rows(
        jnp.concatenate([pad_cols(params["Uz"].T), pad_cols(params["Ur"].T)], axis=1)
    ).astype(matmul_dtype)                                            # (Hp, 2*Hp)
    us_pack = pad_rows(pad_cols(params["Us"].T)).astype(matmul_dtype)  # (Hp, Hp)

    def pad_b(b):
        return jnp.pad(b, (0, Hp - H))

    b_pack = jnp.concatenate(
        [pad_b(params["bz"]), pad_b(params["br"]), pad_b(params["bs"])]
    ).reshape(1, 3 * Hp).astype(jnp.float32)                          # (1, 3*Hp)

    return {"W": w_pack, "Uzr": uzr_pack, "Us": us_pack, "b": b_pack}


# ---------------------------------------------------------------------------
# Wrappers
# ---------------------------------------------------------------------------
@functools.partial(jax.jit, static_argnames=("hidden_size",))
def gru_sequence_forward(xs, masks, last_s, packed, *, hidden_size):
    """Runs the GRU cell over xs[t], t = 0..T-1, inside a single pallas_call.

    xs:     (T, B, input_size)
    masks:  (T, B, 1) or (T, B)   (1.0 = update, 0.0 = keep previous state)
    last_s: (B, hidden_size) or None (-> zeros, like the PyTorch module)
    Returns (T, B, hidden_size): the hidden state after every step.
    """
    T, B, I = xs.shape
    H = hidden_size
    Hp = packed["Us"].shape[0]

    if last_s is None:
        s0 = jnp.zeros((B, Hp), jnp.float32)
    else:
        s0 = jnp.pad(last_s.astype(jnp.float32), ((0, 0), (0, Hp - H)))

    masks = masks.reshape(T, B, 1).astype(jnp.float32)
    xs = xs.astype(jnp.float32)

    out = pl.pallas_call(
        _gru_seq_kernel,
        out_shape=jax.ShapeDtypeStruct((T, B, Hp), jnp.float32),
        grid_spec=pltpu.PrefetchScalarGridSpec(
            num_scalar_prefetch=0,
            grid=(T,),
            in_specs=[
                pl.BlockSpec((None, B, I), lambda t: (t, 0, 0)),    # x[t]  (streamed)
                pl.BlockSpec((None, B, 1), lambda t: (t, 0, 0)),    # mask[t] (streamed)
                pl.BlockSpec((B, Hp), lambda t: (0, 0)),            # s0     (resident)
                pl.BlockSpec((I, 3 * Hp), lambda t: (0, 0)),        # W      (resident)
                pl.BlockSpec((Hp, 2 * Hp), lambda t: (0, 0)),       # Uzr    (resident)
                pl.BlockSpec((Hp, Hp), lambda t: (0, 0)),           # Us     (resident)
                pl.BlockSpec((1, 3 * Hp), lambda t: (0, 0)),        # b      (resident)
            ],
            out_specs=pl.BlockSpec((None, B, Hp), lambda t: (t, 0, 0)),
            scratch_shapes=[pltpu.VMEM((B, Hp), jnp.float32)],      # carried state
        ),
        compiler_params=pltpu.CompilerParams(
            dimension_semantics=("arbitrary",),   # sequential recurrence over t
        ),
    )(xs, masks, s0, packed["W"], packed["Uzr"], packed["Us"], packed["b"])

    # TODO(synk): for large hidden sizes on v7x (64 MiB VMEM), tile the 3*Hp/2*Hp
    # weight lane dims with an extra grid axis and set vmem_limit_bytes explicitly
    # instead of keeping whole weights resident; at these shapes everything fits.
    return out[:, :, :H]


@functools.partial(jax.jit, static_argnames=("hidden_size",))
def gru_cell_forward(x, mask, last_s, packed, *, hidden_size):
    """Exact GRUCell.forward(x, mask, last_s) semantics (one step == T=1)."""
    out = gru_sequence_forward(
        x[None], mask[None], last_s, packed, hidden_size=hidden_size
    )
    return out[0]


# ---------------------------------------------------------------------------
# Pure-JAX reference (mirrors the PyTorch module) + init
# ---------------------------------------------------------------------------
def _reference_step(x, mask, last_s, params):
    if last_s is None:
        last_s = jnp.zeros((x.shape[0], params["Uz"].shape[0]), jnp.float32)
    z = jax.nn.sigmoid(x @ params["Wz"].T + last_s @ params["Uz"].T + params["bz"])
    r = jax.nn.sigmoid(x @ params["Wr"].T + last_s @ params["Ur"].T + params["br"])
    s_hat = jax.nn.relu(
        x @ params["Ws"].T + (last_s * r) @ params["Us"].T + params["bs"]
    )
    s = (1.0 - z) * last_s + z * s_hat
    return last_s * (1.0 - mask) + s * mask


def _init_params(key, input_size, hidden_size):
    """Matches GRUCell.reset_parameters: uniform(-stdv, stdv), stdv = 1/sqrt(hidden)."""
    stdv = 1.0 / np.sqrt(hidden_size)
    ks = jax.random.split(key, 9)
    u = lambda k, shape: jax.random.uniform(k, shape, jnp.float32, -stdv, stdv)
    return {
        "Ws": u(ks[0], (hidden_size, input_size)),
        "Wr": u(ks[1], (hidden_size, input_size)),
        "Wz": u(ks[2], (hidden_size, input_size)),
        "Us": u(ks[3], (hidden_size, hidden_size)),
        "Ur": u(ks[4], (hidden_size, hidden_size)),
        "Uz": u(ks[5], (hidden_size, hidden_size)),
        "bs": u(ks[6], (hidden_size,)),
        "br": u(ks[7], (hidden_size,)),
        "bz": u(ks[8], (hidden_size,)),
    }


if __name__ == "__main__":
    B, input_size, hidden_size, T = 8, 16, 32, 6

    root = jax.random.PRNGKey(0)
    k_params, k_x, k_m, k_s = jax.random.split(root, 4)

    params = _init_params(k_params, input_size, hidden_size)
    xs = jax.random.normal(k_x, (T, B, input_size), jnp.float32)
    # mask: mix of "update" and "keep previous state" positions per step.
    masks = (jax.random.uniform(k_m, (T, B, 1)) > 0.25).astype(jnp.float32)
    s_init = jax.random.normal(k_s, (B, hidden_size), jnp.float32) * 0.1

    # One-time weight packing (hoisted out of the step path).
    packed_f32 = pack_gru_params(params, jnp.float32)
    packed_bf16 = pack_gru_params(params, jnp.bfloat16)

    # --- single-step module semantics: last_s=None, then feed the state back in.
    s1 = gru_cell_forward(xs[0], masks[0], None, packed_f32, hidden_size=hidden_size)
    s2 = gru_cell_forward(xs[1], masks[1], s1, packed_f32, hidden_size=hidden_size)

    # --- full sequence inside ONE kernel (launch + weight DMA amortized over T).
    seq_none = gru_sequence_forward(xs, masks, None, packed_f32, hidden_size=hidden_size)
    seq_init = gru_sequence_forward(xs, masks, s_init, packed_f32, hidden_size=hidden_size)
    seq_bf16 = gru_sequence_forward(xs, masks, s_init, packed_bf16, hidden_size=hidden_size)
    jax.block_until_ready((s1, s2, seq_none, seq_init, seq_bf16))

    # References
    r1 = _reference_step(xs[0], masks[0], None, params)
    r2 = _reference_step(xs[1], masks[1], r1, params)

    def ref_sequence(xs_, masks_, last_s_):
        outs, state = [], last_s_
        for t in range(xs_.shape[0]):
            state = _reference_step(xs_[t], masks_[t], state, params)
            outs.append(state)
        return jnp.stack(outs, axis=0)

    ref_none = ref_sequence(xs, masks, None)
    ref_init = ref_sequence(xs, masks, s_init)

    np.testing.assert_allclose(np.asarray(s1), np.asarray(r1), rtol=1e-5, atol=1e-5)
    np.testing.assert_allclose(np.asarray(s2), np.asarray(r2), rtol=1e-5, atol=1e-5)
    np.testing.assert_allclose(np.asarray(seq_none), np.asarray(ref_none),
                               rtol=1e-5, atol=1e-5)
    np.testing.assert_allclose(np.asarray(seq_init), np.asarray(ref_init),
                               rtol=1e-5, atol=1e-5)
    # bf16 matmul operands with f32 accumulation: relaxed parity per review.
    np.testing.assert_allclose(np.asarray(seq_bf16), np.asarray(ref_init),
                               rtol=5e-2, atol=5e-2)

    assert s1.shape == (B, hidden_size)
    assert s2.shape == (B, hidden_size)
    assert seq_none.shape == (T, B, hidden_size)
    print("KERNEL_OK")
</pallas_src>

<mosaic_0001>
module attributes {stable_mosaic.version = 11 : i64} {
  func.func @_gru_seq_kernel(%arg0: i32, %arg1: memref<1x8x16xf32, #tpu.memory_space<vmem>>, %arg2: memref<1x8x1xf32, #tpu.memory_space<vmem>>, %arg3: memref<8x128xf32, #tpu.memory_space<vmem>>, %arg4: memref<16x384xf32, #tpu.memory_space<vmem>>, %arg5: memref<128x256xf32, #tpu.memory_space<vmem>>, %arg6: memref<128x128xf32, #tpu.memory_space<vmem>>, %arg7: memref<1x384xf32, #tpu.memory_space<vmem>>, %arg8: memref<1x8x128xf32, #tpu.memory_space<vmem>>, %arg9: memref<8x128xf32, #tpu.memory_space<vmem>>) attributes {dimension_semantics = [#tpu.dimension_semantics<arbitrary>], iteration_bounds = array<i64: 1>, scalar_prefetch = 0 : i64, scratch_operands = 1 : i64, tpu.core_type = #tpu.core_type<tc>, window_params = [{transform_indices = @transform_0, window_bounds = array<i64: 1, 8, 16>}, {transform_indices = @transform_1, window_bounds = array<i64: 1, 8, 1>}, {pipeline_mode = #tpu.pipeline_mode<synchronous>, transform_indices = @transform_2, window_bounds = array<i64: 8, 128>}, {pipeline_mode = #tpu.pipeline_mode<synchronous>, transform_indices = @transform_3, window_bounds = array<i64: 16, 384>}, {pipeline_mode = #tpu.pipeline_mode<synchronous>, transform_indices = @transform_4, window_bounds = array<i64: 128, 256>}, {pipeline_mode = #tpu.pipeline_mode<synchronous>, transform_indices = @transform_5, window_bounds = array<i64: 128, 128>}, {pipeline_mode = #tpu.pipeline_mode<synchronous>, transform_indices = @transform_6, window_bounds = array<i64: 1, 384>}, {transform_indices = @transform_7, window_bounds = array<i64: 1, 8, 128>}]} {
    %c0_i32 = arith.constant 0 : i32
    %0 = arith.cmpi eq, %arg0, %c0_i32 : i32
    %1 = arith.extui %0 : i1 to i32
    %c0_i32_0 = arith.constant 0 : i32
    %2 = arith.cmpi ne, %1, %c0_i32_0 : i32
    scf.if %2 {
      %c0_25 = arith.constant 0 : index
      %c0_26 = arith.constant 0 : index
      %40 = vector.load %arg3[%c0_25, %c0_26] : memref<8x128xf32, #tpu.memory_space<vmem>>, vector<8x128xf32>
      %c0_27 = arith.constant 0 : index
      %c0_28 = arith.constant 0 : index
      %41 = vector.load %arg9[%c0_27, %c0_28] : memref<8x128xf32, #tpu.memory_space<vmem>>, vector<8x128xf32>
      tpu.vector_store %arg9[%c0_27, %c0_28], %40 {strides = array<i32>} : memref<8x128xf32, #tpu.memory_space<vmem>>, vector<8x128xf32>,
    } else {
    }
    %c0 = arith.constant 0 : index
    %c0_1 = arith.constant 0 : index
    %3 = vector.load %arg9[%c0, %c0_1] : memref<8x128xf32, #tpu.memory_space<vmem>>, vector<8x128xf32>
    %c0_2 = arith.constant 0 : index
    %c0_3 = arith.constant 0 : index
    %c0_4 = arith.constant 0 : index
    %4 = vector.load %arg2[%c0_2, %c0_3, %c0_4] : memref<1x8x1xf32, #tpu.memory_space<vmem>>, vector<1x8x1xf32>
    %5 = vector.shape_cast %4 : vector<1x8x1xf32> to vector<8x1xf32>
    %c0_5 = arith.constant 0 : index
    %c0_6 = arith.constant 0 : index
    %6 = vector.load %arg4[%c0_5, %c0_6] : memref<16x384xf32, #tpu.memory_space<vmem>>, vector<16x384xf32>
    %c0_7 = arith.constant 0 : index
    %c0_8 = arith.constant 0 : index
    %7 = vector.load %arg5[%c0_7, %c0_8] : memref<128x256xf32, #tpu.memory_space<vmem>>, vector<128x256xf32>
    %c0_9 = arith.constant 0 : index
    %c0_10 = arith.constant 0 : index
    %8 = vector.load %arg6[%c0_9, %c0_10] : memref<128x128xf32, #tpu.memory_space<vmem>>, vector<128x128xf32>
    %c0_11 = arith.constant 0 : index
    %c0_12 = arith.constant 0 : index
    %c0_13 = arith.constant 0 : index
    %9 = vector.load %arg1[%c0_11, %c0_12, %c0_13] : memref<1x8x16xf32, #tpu.memory_space<vmem>>, vector<1x8x16xf32>
    %10 = vector.shape_cast %9 : vector<1x8x16xf32> to vector<8x16xf32>
    %cst = arith.constant dense<0.000000e+00> : vector<8x384xf32>
    %11 = tpu.matmul %10, %6, %cst {dimension_numbers = #tpu.dot_dimension_numbers<[1], [0], [0], [1], [0, 0, 1, 1], [], []>} : vector<8x16xf32>, vector<16x384xf32>, vector<8x384xf32> -> vector<8x384xf32>
    %c0_14 = arith.constant 0 : index
    %c0_15 = arith.constant 0 : index
    %12 = vector.load %arg7[%c0_14, %c0_15] : memref<1x384xf32, #tpu.memory_space<vmem>>, vector<1x384xf32>
    %13 = vector.broadcast %12 : vector<1x384xf32> to vector<8x384xf32>
    %14 = arith.addf %11, %13 : vector<8x384xf32>
    %cst_16 = arith.constant dense<0.000000e+00> : vector<8x256xf32>
    %15 = tpu.matmul %3, %7, %cst_16 {dimension_numbers = #tpu.dot_dimension_numbers<[1], [0], [0], [1], [0, 0, 1, 1], [], []>} : vector<8x128xf32>, vector<128x256xf32>, vector<8x256xf32> -> vector<8x256xf32>
    %16 = vector.extract_strided_slice %14 {offsets = [0, 0], sizes = [8, 256], strides = [1, 1]} : vector<8x384xf32> to vector<8x256xf32>
    %17 = arith.addf %16, %15 : vector<8x256xf32>
    %18 = arith.negf %17 : vector<8x256xf32>
    %19 = math.exp %18 : vector<8x256xf32>
    %cst_17 = arith.constant 1.000000e+00 : f32
    %20 = vector.broadcast %cst_17 : f32 to vector<8x256xf32>
    %21 = arith.addf %20, %19 : vector<8x256xf32>
    %22 = arith.divf %20, %21 : vector<8x256xf32>
    %23 = vector.extract_strided_slice %22 {offsets = [0, 0], sizes = [8, 128], strides = [1, 1]} : vector<8x256xf32> to vector<8x128xf32>
    %24 = vector.extract_strided_slice %22 {offsets = [0, 128], sizes = [8, 128], strides = [1, 1]} : vector<8x256xf32> to vector<8x128xf32>
    %25 = vector.extract_strided_slice %14 {offsets = [0, 256], sizes = [8, 128], strides = [1, 1]} : vector<8x384xf32> to vector<8x128xf32>
    %26 = arith.mulf %3, %24 : vector<8x128xf32>
    %cst_18 = arith.constant dense<0.000000e+00> : vector<8x128xf32>
    %27 = tpu.matmul %26, %8, %cst_18 {dimension_numbers = #tpu.dot_dimension_numbers<[1], [0], [0], [1], [0, 0, 1, 1], [], []>} : vector<8x128xf32>, vector<128x128xf32>, vector<8x128xf32> -> vector<8x128xf32>
    %28 = arith.addf %25, %27 : vector<8x128xf32>
    %cst_19 = arith.constant 0.000000e+00 : f32
    %29 = vector.broadcast %cst_19 : f32 to vector<8x128xf32>
    %30 = arith.maximumf %28, %29 : vector<8x128xf32>
    %31 = vector.broadcast %5 : vector<8x1xf32> to vector<8x128xf32>
    %32 = arith.mulf %31, %23 : vector<8x128xf32>
    %33 = arith.subf %30, %3 : vector<8x128xf32>
    %34 = arith.mulf %32, %33 : vector<8x128xf32>
    %35 = arith.addf %3, %34 : vector<8x128xf32>
    %c0_20 = arith.constant 0 : index
    %c0_21 = arith.constant 0 : index
    %36 = vector.load %arg9[%c0_20, %c0_21] : memref<8x128xf32, #tpu.memory_space<vmem>>, vector<8x128xf32>
    tpu.vector_store %arg9[%c0_20, %c0_21], %35 {strides = array<i32>} : memref<8x128xf32, #tpu.memory_space<vmem>>, vector<8x128xf32>,
    %c0_22 = arith.constant 0 : index
    %c0_23 = arith.constant 0 : index
    %c0_24 = arith.constant 0 : index
    %37 = vector.load %arg8[%c0_22, %c0_23, %c0_24] : memref<1x8x128xf32, #tpu.memory_space<vmem>>, vector<1x8x128xf32>
    %38 = vector.shape_cast %37 : vector<1x8x128xf32> to vector<8x128xf32>
    %39 = vector.shape_cast %35 : vector<8x128xf32> to vector<1x8x128xf32>
    tpu.vector_store %arg8[%c0_22, %c0_23, %c0_24], %39 {strides = array<i32>} : memref<1x8x128xf32, #tpu.memory_space<vmem>>, vector<1x8x128xf32>,
    return
  }
  func.func @transform_0(%arg0: i32) -> (i32, i32, i32) {
    %c0_i32 = arith.constant 0 : i32
    %c0_i32_0 = arith.constant 0 : i32
    %c0_i32_1 = arith.constant 0 : i32
    return %arg0, %c0_i32, %c0_i32_0 : i32, i32, i32
  }
  func.func @transform_1(%arg0: i32) -> (i32, i32, i32) {
    %c0_i32 = arith.constant 0 : i32
    %c0_i32_0 = arith.constant 0 : i32
    %c0_i32_1 = arith.constant 0 : i32
    return %arg0, %c0_i32, %c0_i32_0 : i32, i32, i32
  }
  func.func @transform_2(%arg0: i32) -> (i32, i32) {
    %c0_i32 = arith.constant 0 : i32
    %c0_i32_0 = arith.constant 0 : i32
    %c0_i32_1 = arith.constant 0 : i32
    return %c0_i32, %c0_i32_0 : i32, i32
  }
  func.func @transform_3(%arg0: i32) -> (i32, i32) {
    %c0_i32 = arith.constant 0 : i32
    %c0_i32_0 = arith.constant 0 : i32
    %c0_i32_1 = arith.constant 0 : i32
    return %c0_i32, %c0_i32_0 : i32, i32
  }
  func.func @transform_4(%arg0: i32) -> (i32, i32) {
    %c0_i32 = arith.constant 0 : i32
    %c0_i32_0 = arith.constant 0 : i32
    %c0_i32_1 = arith.constant 0 : i32
    return %c0_i32, %c0_i32_0 : i32, i32
  }
  func.func @transform_5(%arg0: i32) -> (i32, i32) {
    %c0_i32 = arith.constant 0 : i32
    %c0_i32_0 = arith.constant 0 : i32
    %c0_i32_1 = arith.constant 0 : i32
    return %c0_i32, %c0_i32_0 : i32, i32
  }
  func.func @transform_6(%arg0: i32) -> (i32, i32) {
    %c0_i32 = arith.constant 0 : i32
    %c0_i32_0 = arith.constant 0 : i32
    %c0_i32_1 = arith.constant 0 : i32
    return %c0_i32, %c0_i32_0 : i32, i32
  }
  func.func @transform_7(%arg0: i32) -> (i32, i32, i32) {
    %c0_i32 = arith.constant 0 : i32
    %c0_i32_0 = arith.constant 0 : i32
    %c0_i32_1 = arith.constant 0 : i32
    return %arg0, %c0_i32, %c0_i32_0 : i32, i32, i32
  }
}

</mosaic_0001>

<bundles_post_ra>
// kernel: gru_sequence_forward.1
= control target key start
LH: loop header
LB: loop body
LE: loop exit
PB: predicated region body
PF: predicated region fallthrough
CT: control target
= control target key end

     0   :  { %12 = vsyncpa [#allocation4], 0  ;;  %s868_s0 = inlined_call_operand.vmem [shape: f32[1,8,16], index: 0, kind: input, shape index: {}]   ;;  %s869_s1 = inlined_call_operand.vmem [shape: f32[1,8,1], index: 1, kind: input, shape index: {}]   ;;  %s870_s2 = inlined_call_operand.vmem [shape: f32[8,128], index: 2, kind: input, shape index: {}]   ;;  %s871_s3 = inlined_call_operand.hbm [shape: f32[16,384], index: 3, kind: input, shape index: {}]   ;;  %s872_s4 = inlined_call_operand.hbm [shape: f32[128,256], index: 4, kind: input, shape index: {}]   ;;  %s873_s5 = inlined_call_operand.hbm [shape: f32[128,128], index: 5, kind: input, shape index: {}]   ;;  %s874_s6 = inlined_call_operand.vmem [shape: f32[1,384], index: 6, kind: input, shape index: {}]   ;;  %s875_s7 = inlined_call_operand.hbm [shape: f32[1,8,128], index: 7, kind: output, shape index: {}]  }
   0x1   :  { %13 = vsyncpa [#allocation7], 0 }
   0x2   :  { %14 = vsyncpa [#allocation5], 0  ;;  %s731_s24 = smov [#allocation6]   ;;  %s637_s28 = scalar_lea.hbm %s872_s4, 4096 }
   0x3   :  { %s38_s25 = sshll.u32 %s731_s24, 4  ;;  %p638_p0 = scmp.ne.s32.totalorder %s872_s4, %s637_s28  ;;  %s39_s25 = int_to_ptr.vmem [resolvable:$true] %s38_s25 }
   0x4   :  { %p641_p1 = scmp.lt.u32.totalorder %s637_s28, %s872_s4 }
   0x6   :  { %p643_p2 = pnand %p641_p1, %p638_p0 }
   0x8   :  { %646 = shalt.err (!%p643_p2)
}
   0x9   :  { %s647_s10 = scalar_lea.vmem %s39_s25, 4096  ;;  %p652_p4 = scmp.lt.s32.totalorder %s39_s25, %s39_s25 }
   0xa   :  { %p648_p3 = scmp.ne.s32.totalorder %s39_s25, %s647_s10  ;;  %p653_p5 = scmp.lt.s32.totalorder %s647_s10, %s647_s10 }
   0xc   :  { %p654_p6 = por %p653_p5, %p652_p4 }
   0xe   :  { %p655_p7 = pnand %p654_p6, %p648_p3 }
  0x10   :  { %658 = shalt.err (!%p655_p7)
}
  0x11   :  { %s732_s11 = smov 256   ;;  %s733_s12 = smov 16  }
  0x12   :  { %44 = dma.hbm_to_vmem [thread:$0]  %s872_s4, 4096, %s39_s25, [#allocation7], %s732_s11, %s732_s11, %s733_s12  }
  0x13   :  { %s734_s15 = smov [#allocation3]   ;;  %s659_s19 = scalar_lea.hbm %s871_s3, 768 }
  0x14   :  { %s26_s16 = sshll.u32 %s734_s15, 4  ;;  %p660_p8 = scmp.ne.s32.totalorder %s871_s3, %s659_s19  ;;  %s27_s16 = int_to_ptr.vmem [resolvable:$true] %s26_s16 }
  0x15   :  { %p663_p9 = scmp.lt.u32.totalorder %s659_s19, %s871_s3 }
  0x17   :  { %p665_p10 = pnand %p663_p9, %p660_p8 }
  0x19   :  { %668 = shalt.err (!%p665_p10)
}
  0x1a   :  { %s669_s24 = scalar_lea.vmem %s27_s16, 768  ;;  %p674_p12 = scmp.lt.s32.totalorder %s27_s16, %s27_s16 }
  0x1b   :  { %p670_p11 = scmp.ne.s32.totalorder %s27_s16, %s669_s24  ;;  %p675_p13 = scmp.lt.s32.totalorder %s669_s24, %s669_s24 }
  0x1d   :  { %p676_p0 = por %p675_p13, %p674_p12 }
  0x1f   :  { %p677_p1 = pnand %p676_p0, %p670_p11 }
  0x21   :  { %680 = shalt.err (!%p677_p1)
}
  0x22   :  { %s735_s4 = smov 384   ;;  %s736_s25 = smov 24  }
  0x23   :  { %32 = dma.hbm_to_vmem [thread:$0]  %s871_s3, 768, %s27_s16, [#allocation4], %s735_s4, %s735_s4, %s736_s25  }
  0x24   :  { %s737_s28 = smov [#allocation8]   ;;  %s681_s9 = scalar_lea.hbm %s873_s5, 2048 }
  0x25   :  { %s50_s29 = sshll.u32 %s737_s28, 4  ;;  %p682_p2 = scmp.ne.s32.totalorder %s873_s5, %s681_s9  ;;  %s51_s29 = int_to_ptr.vmem [resolvable:$true] %s50_s29 }
  0x26   :  { %p685_p3 = scmp.lt.u32.totalorder %s681_s9, %s873_s5 }
  0x28   :  { %p687_p4 = pnand %p685_p3, %p682_p2 }
  0x2a   :  { %690 = shalt.err (!%p687_p4)
}
  0x2b   :  { %s691_s14 = scalar_lea.vmem %s51_s29, 2048  ;;  %p696_p6 = scmp.lt.s32.totalorder %s51_s29, %s51_s29 }
  0x2c   :  { %p692_p5 = scmp.ne.s32.totalorder %s51_s29, %s691_s14  ;;  %p697_p7 = scmp.lt.s32.totalorder %s691_s14, %s691_s14 }
  0x2e   :  { %p698_p8 = por %p697_p7, %p696_p6 }
  0x30   :  { %p699_p9 = pnand %p698_p8, %p692_p5 }
  0x32   :  { %702 = shalt.err (!%p699_p9)
}
  0x33   :  { %s738_s3 = smov 128   ;;  %s739_s15 = smov 8  }
  0x34   :  { %56 = dma.hbm_to_vmem [thread:$0]  %s873_s5, 2048, %s51_s29, [#allocation7], %s738_s3, %s738_s3, %s739_s15  }
  0x35   :  { %725 = dma.done.wait [#allocation4], 768  }
  0x36   :  { %726 = vsyncadd [#allocation4], 4294966528 }
  0x37   :  { %727 = dma.done.wait [#allocation7], 6144  }
  0x38   :  { %728 = vsyncadd [#allocation7], 4294961152  ;;  %v740_v0 = vmov 0.0   ;;  %v741_v1 = vmov 0   ;;  %v742_v2 = vmov 0.0|0.0   ;;  %vm743_vm0 = vmmov 0  }
  0x39   :  { %216 = vmatprep.mubr.f32.mxu0 %v740_v0  ;;  %628 = vset.pattern.permute.xlu0 %v741_v1  ;;  %v77_v3 = vld [vmem:[#allocation3 + $0x8] sm:$0xff]  ;;  %v80_v4 = vld [vmem:[#allocation3 + $0x20] sm:$0xff]  ;;  %v79_v7 = vld [vmem:[#allocation3 + $0x18] sm:$0xff]  ;;  %vm148_vm1 = vcmask 130048  }
  0x3a   :  { %548 = vmatprep.subr.bf16.mxu1 %v742_v2  ;;  %506 = vmatprep.mubr.msk.f32.mxu1 %vm743_vm0, %v740_v0  ;;  %v76_v5 = vld [vmem:[#allocation3] sm:$0xff]  ;;  %v544_v6 = vpack.c.bf16 %v80_v4, %v77_v3  ;;  %v83_v8 = vld [vmem:[#allocation6 + $0x8] sm:$0xff]  ;;  %v85_v9 = vld [vmem:[#allocation6 + $0x18] sm:$0xff] }
  0x3b   :  { %v546_v10 = vpack.c.bf16 %v79_v7, %v76_v5  ;;  %v551_v11 = vpack.c.bf16 %v85_v9, %v83_v8  ;;  %v82_v12 = vld [vmem:[#allocation6] sm:$0xff]  ;;  %v84_v13 = vld [vmem:[#allocation6 + $0x10] sm:$0xff]  ;;  %v87_v14 = vld [vmem:[#allocation6 + $0x28] sm:$0xff] }
  0x3c   :  { %545 = vmatprep.subr.bf16.mxu0 %v544_v6  ;;  %v89_v15 = vld [vmem:[#allocation6 + $0x38] sm:$0xff]  ;;  %v130_v16 = vld [vmem:[%s868_s0] sm:$0xff]  ;;  %v553_v17 = vpack.c.bf16 %v84_v13, %v82_v12  ;;  %v86_v19 = vld [vmem:[#allocation6 + $0x20] sm:$0xff] }
  0x3d   :  { %547 = vmatpush1.bf16.msra.mxu0 %v546_v10  ;;  %v555_v18 = vpack.c.bf16 %v89_v15, %v87_v14  ;;  %v88_v20 = vld [vmem:[#allocation6 + $0x30] sm:$0xff]  ;;  %v91_v21 = vld [vmem:[#allocation6 + $0x48] sm:$0xff]  ;;  %v93_v22 = vld [vmem:[#allocation6 + $0x58] sm:$0xff] }
  0x3e   :  { %552 = vmatprep.subr.bf16.mxu0 %v551_v11  ;;  %v557_v23 = vpack.c.bf16 %v88_v20, %v86_v19  ;;  %v559_v24 = vpack.c.bf16 %v93_v22, %v91_v21  ;;  %v90_v25 = vld [vmem:[#allocation6 + $0x40] sm:$0xff]  ;;  %v92_v26 = vld [vmem:[#allocation6 + $0x50] sm:$0xff]  ;;  %v95_v27 = vld [vmem:[#allocation6 + $0x68] sm:$0xff] }
  0x3f   :  { %v97_v28 = vld [vmem:[#allocation6 + $0x78] sm:$0xff]  ;;  %v561_v29 = vpack.c.bf16 %v92_v26, %v90_v25  ;;  %v94_v30 = vld [vmem:[#allocation6 + $0x60] sm:$0xff]  ;;  %v75_v31 = vld [vmem:[%s869_s1] sm:$0xff] }
  0x40   :  { %478 = vmatmul.mubr.msk.f32.vlgmr.msra.gmra.mrb[0].mxu0 %vm148_vm1, %v130_v16  ;;  %v563_v32 = vpack.c.bf16 %v97_v28, %v95_v27  ;;  %v96_v33 = vld [vmem:[#allocation6 + $0x70] sm:$0xff]  ;;  %453 = vperm.xlu0 %628, %v75_v31   ;;  %v78_v34 = vld [vmem:[#allocation3 + $0x10] sm:$0xff]  ;;  %v81_v35 = vld [vmem:[#allocation3 + $0x28] sm:$0xff] }
  0x41   :  { %554 = vmatpush1.bf16.msra.mxu0 %v553_v17  ;;  %357 = vmatprep.mubr.f32.mxu0 %v740_v0  ;;  %v99_v36 = vld [vmem:[#allocation6 + $0x88] sm:$0xff]  ;;  %v101_v37 = vld [vmem:[#allocation6 + $0x98] sm:$0xff]  ;;  %v549_v38 = vpack.c.bf16 %v81_v35, %v78_v34  ;;  %v565_v39 = vpack.c.bf16 %v96_v33, %v94_v30  ;;  %v98_v41 = vld [vmem:[#allocation6 + $0x80] sm:$0xff] }
  0x42   :  { %556 = vmatprep.subr.bf16.mxu0 %v555_v18  ;;  %v567_v40 = vpack.c.bf16 %v101_v37, %v99_v36  ;;  %v100_v42 = vld [vmem:[#allocation6 + $0x90] sm:$0xff]  ;;  %v103_v43 = vld [vmem:[#allocation6 + $0xa8] sm:$0xff]  ;;  %v105_v44 = vld [vmem:[#allocation6 + $0xb8] sm:$0xff] }
  0x43   :  { %550 = vmatpush3.bf16.msra.mxu1 %v549_v38  ;;  %v569_v45 = vpack.c.bf16 %v100_v42, %v98_v41  ;;  %v571_v46 = vpack.c.bf16 %v105_v44, %v103_v43  ;;  %v102_v47 = vld [vmem:[#allocation6 + $0xa0] sm:$0xff]  ;;  %v104_v48 = vld [vmem:[#allocation6 + $0xb0] sm:$0xff]  ;;  %v107_v49 = vld [vmem:[#allocation6 + $0xc8] sm:$0xff] }
  0x44   :  { %583 = vmatprep.subr.bf16.mxu1 %v742_v2  ;;  %v109_v50 = vld [vmem:[#allocation6 + $0xd8] sm:$0xff]  ;;  %v573_v51 = vpack.c.bf16 %v104_v48, %v102_v47  ;;  %v106_v53 = vld [vmem:[#allocation6 + $0xc0] sm:$0xff]  ;;  %v108_v54 = vld [vmem:[#allocation6 + $0xd0] sm:$0xff] }
  0x45   :  { %558 = vmatpush1.bf16.msra.mxu0 %v557_v23  ;;  %v575_v52 = vpack.c.bf16 %v109_v50, %v107_v49  ;;  %v111_v55 = vld [vmem:[#allocation6 + $0xe8] sm:$0xff]  ;;  %v113_v56 = vld [vmem:[#allocation6 + $0xf8] sm:$0xff]  ;;  %v577_v57 = vpack.c.bf16 %v108_v54, %v106_v53  ;;  %v110_v59 = vld [vmem:[#allocation6 + $0xe0] sm:$0xff] }
  0x46   :  { %560 = vmatprep.subr.bf16.mxu0 %v559_v24  ;;  %507 = vmatmul.mubr.msk.f32.vlgmr.msra.gmra.mrb[0].mxu1 %vm148_vm1, %v130_v16  ;;  %v579_v58 = vpack.c.bf16 %v113_v56, %v111_v55  ;;  %v112_v60 = vld [vmem:[#allocation6 + $0xf0] sm:$0xff]  ;;  %v114_v63 = vld [vmem:[#allocation8] sm:$0xff]  ;;  %v117_v4 = vld [vmem:[#allocation8 + $0x18] sm:$0xff]  ;;  %v133_v24 = vlaneseq }
  0x47   :  { %541 = vmatprep.mubr.msk.f32.mxu1 %vm743_vm0, %v740_v0  ;;  %v581_v61 = vpack.c.bf16 %v112_v60, %v110_v59  ;;  %v840_v62 = vld [vmem:[%s870_s2] sm:$0xff]  ;;  %v115_v0 = vld [vmem:[#allocation8 + $0x8] sm:$0xff]  ;;  %v118_v6 = vld [vmem:[#allocation8 + $0x20] sm:$0xff] }
  0x48   :  { %v584_v1 = vpack.c.bf16 %v115_v0, %v114_v63  ;;  %v116_v3 = vld [vmem:[#allocation8 + $0x10] sm:$0xff]  ;;  %v119_v7 = vld [vmem:[#allocation8 + $0x28] sm:$0xff]  ;;  %v121_v10 = vld [vmem:[#allocation8 + $0x38] sm:$0xff]  ;;  %v134_v25 = vshrl.u32 %v133_v24, 7 }
  0x49   :  { %562 = vmatpush1.bf16.msra.mxu0 %v561_v29  ;;  %v587_v5 = vpack.c.bf16 %v117_v4, %v116_v3  ;;  %v590_v8 = vpack.c.bf16 %v119_v7, %v118_v6  ;;  %v120_v9 = vld [vmem:[#allocation8 + $0x30] sm:$0xff]  ;;  %v122_v12 = vld [vmem:[#allocation8 + $0x40] sm:$0xff]  ;;  %v123_v13 = vld [vmem:[#allocation8 + $0x48] sm:$0xff] }
  0x4a   :  { %564 = vmatprep.subr.bf16.mxu0 %v563_v32  ;;  %585 = vmatpush3.bf16.msra.mxu1 %v584_v1  ;;  %v593_v11 = vpack.c.bf16 %v121_v10, %v120_v9  ;;  %v596_v14 = vpack.c.bf16 %v123_v13, %v122_v12  ;;  %v124_v15 = vld [vmem:[#allocation8 + $0x50] sm:$0xff]  ;;  %v125_v16 = vld [vmem:[#allocation8 + $0x58] sm:$0xff]  ;;  %v126_v18 = vld [vmem:[#allocation8 + $0x60] sm:$0xff]  ;;  %v139_v26 = vsub.s32 1, %v134_v25  ;;  %v135_v36 = vsub.s32 0, %v134_v25 }
  0x4b   :  { %586 = vmatprep.subr.bf16.mxu1 %v742_v2  ;;  %v599_v17 = vpack.c.bf16 %v125_v16, %v124_v15  ;;  %v127_v19 = vld [vmem:[#allocation8 + $0x68] sm:$0xff]  ;;  %v128_v21 = vld [vmem:[#allocation8 + $0x70] sm:$0xff]  ;;  %v129_v22 = vld [vmem:[#allocation8 + $0x78] sm:$0xff]  ;;  %v143_v42 = vsub.s32 2, %v134_v25 }
  0x4c   :  { %v602_v20 = vpack.c.bf16 %v127_v19, %v126_v18  ;;  %v605_v23 = vpack.c.bf16 %v129_v22, %v128_v21  ;;  %v131_v27 = vld [vmem:[%s874_s6] sm:$0x7]  ;;  %s744_s6 = smov [#allocation9]  }
  0x4d   :  { %566 = vmatpush1.bf16.msra.mxu0 %v565_v39  ;;  %v140_v28 = vrot.slane %v131_v27, %v139_v26  ;;  %v136_v37 = vrot.slane %v131_v27, %v135_v36  ;;  %v144_v43 = vrot.slane %v131_v27, %v143_v42  ;;  %s468_s22 = sshll.u32 %s744_s6, 4  ;;  %s469_s22 = int_to_ptr.vmem [resolvable:$true] %s468_s22 }
  0x4e   :  { %568 = vmatprep.subr.bf16.mxu0 %v567_v40  ;;  %588 = vmatpush3.bf16.msra.mxu1 %v587_v5  ;;  %s703_s23 = scalar_lea.vmem %s469_s22, 128  ;;  %p708_p11 = scmp.lt.s32.totalorder %s469_s22, %s469_s22 }
  0x4f   :  { %589 = vmatprep.subr.bf16.mxu1 %v742_v2  ;;  %p704_p10 = scmp.ne.s32.totalorder %s469_s22, %s703_s23  ;;  %p709_p12 = scmp.lt.s32.totalorder %s703_s23, %s703_s23 }
  0x51   :  { %570 = vmatpush1.bf16.msra.mxu0 %v569_v45  ;;  %p710_p13 = por %p709_p12, %p708_p11 }
  0x52   :  { %572 = vmatprep.subr.bf16.mxu0 %v571_v46  ;;  %591 = vmatpush3.bf16.msra.mxu1 %v590_v8 }
  0x53   :  { %592 = vmatprep.subr.bf16.mxu1 %v742_v2  ;;  %p711_p0 = pnand %p710_p13, %p704_p10 }
  0x55   :  { %574 = vmatpush1.bf16.msra.mxu0 %v573_v51 }
  0x56   :  { %576 = vmatprep.subr.bf16.mxu0 %v575_v52  ;;  %594 = vmatpush3.bf16.msra.mxu1 %v593_v11 }
  0x57   :  { %595 = vmatprep.subr.bf16.mxu1 %v742_v2 }
  0x59   :  { %578 = vmatpush1.bf16.msra.mxu0 %v577_v57 }
  0x5a   :  { %580 = vmatprep.subr.bf16.mxu0 %v579_v58  ;;  %597 = vmatpush3.bf16.msra.mxu1 %v596_v14 }
  0x5b   :  { %598 = vmatprep.subr.bf16.mxu1 %v742_v2 }
  0x5d   :  { %582 = vmatpush1.bf16.msra.mxu0 %v581_v61 }
  0x5e   :  { %600 = vmatpush3.bf16.msra.mxu1 %v599_v17 }
  0x5f   :  { %601 = vmatprep.subr.bf16.mxu1 %v742_v2 }
  0x60   :  { %358 = vmatmul.mubr.f32.vlgmr.msra.gmra.mrb[0].mxu0 %v840_v62 }
  0x62   :  { %603 = vmatpush3.bf16.msra.mxu1 %v602_v20 }
  0x63   :  { %604 = vmatprep.subr.bf16.mxu1 %v742_v2 }
  0x66   :  { %606 = vmatpush3.bf16.msra.mxu1 %v605_v23 }
  0xbf   :  { %v454_v48 = vpop.permute.xlu0 %453 }
 0x133   :  { %v359_v29 = vpop.f32.mrb[0].mxu0 }
 0x134   :  { %v361_v30 = vpop.f32.mrb[1].mxu0  ;;  %v607_v38 = vadd.f32 %v359_v29, %v136_v37 }
 0x135   :  { %v608_v31 = vadd.f32 %v361_v30, %v140_v28 }
 0x136   :  { %v480_v39 = vmul.f32 -1.442695, %v607_v38 }
 0x137   :  { %v481_v32 = vmul.f32 -1.442695, %v608_v31 }
 0x139   :  { %629 = vpow2.f32 %v481_v32 }
 0x143   :  { %v630_v33 = vpop.eup %629 }
 0x144   :  { %v373_v34 = vadd.f32 1.0, %v630_v33 }
 0x146   :  { %631 = vrcp.f32 %v373_v34 }
 0x147   :  { %633 = vpow2.f32 %v480_v39 }
 0x150   :  { %v632_v2 = vpop.eup %631 }
 0x151   :  { %v378_v35 = vmul.f32 %v632_v2, %v840_v62  ;;  %v634_v40 = vpop.eup %633 }
 0x152   :  { %v372_v41 = vadd.f32 1.0, %v634_v40 }
 0x153   :  { %542 = vmatmul.mubr.f32.vlgmr.msra.gmra.mrb[0].mxu1 %v378_v35 }
 0x154   :  { %635 = vrcp.f32 %v372_v41 }
 0x15e   :  { %v636_v47 = vpop.eup %635 }
 0x15f   :  { %v456_v50 = vmul.f32 %v636_v47, %v454_v48 }
 0x226   :  { %v445_v44 = vpop.f32.mrb[0].mxu1 }
 0x227   :  { %v609_v45 = vadd.f32 %v445_v44, %v144_v43  ;;  %v543_v46 = vpop.f32.mrb[1].mxu1 }
 0x229   :  { %v450_v49 = vmax.f32 %v609_v45, 0.0 }
 0x22b   :  { %v457_v51 = vsub.f32 %v450_v49, %v840_v62 }
 0x22d   :  { %v458_v52 = vmul.f32 %v457_v51, %v456_v50 }
 0x22f   :  { %v459_v53 = vadd.f32 %v458_v52, %v840_v62 }
 0x231   :  { %461 = vst [vmem:[#allocation9] sm:$0xff] %v459_v53 }
 0x232   :  { %714 = shalt.err (!%p711_p0)
}
 0x233   :  { %s715_s25 = scalar_lea.hbm %s875_s7, 128 }
 0x234   :  { %p716_p1 = scmp.ne.s32.totalorder %s875_s7, %s715_s25  ;;  %p719_p2 = scmp.lt.u32.totalorder %s715_s25, %s875_s7 }
 0x236   :  { %p721_p3 = pnand %p719_p2, %p716_p1 }
 0x238   :  { %724 = shalt.err (!%p721_p3)
}
 0x239   :  { %471 = dma.vmem_to_hbm [thread:$0]  %s469_s22, 128, %s875_s7, [#allocation5]  }
 0x23a   :  { %729 = dma.done.wait [#allocation5], 128  }
 0x23b   :  { %730 = vsyncadd [#allocation5], 4294967168 }
 0x23c   :  { %475 = vsyncpa [#allocation4], 1 }
 0x23d   :  { %476 = vsyncpa [#allocation7], 1 }
 0x23e   :  { %477 = vsyncpa [#allocation5], 1 }

</bundles_post_ra>
